<compile_context>
chip_gen: v6e
topology: v6e:2x2x1
jax: 0.10.0
libtpu: 0.0.40
codegen_flags: <defaults>
</compile_context>

<pallas_src>
import functools

import jax
import jax.numpy as jnp
from jax.experimental import pallas as pl
from jax.experimental.pallas import tpu as pltpu

INPUT_SIZE = 28 * 28   # 784
NUM_CLASSES = 10
N_PAD = 128            # MXU-friendly padded class dim for the resident weight


def _round_up(x, m):
    return ((x + m - 1) // m) * m


def linear_kernel(x_ref, wt_ref, b_ref, o_ref):
    # x_ref : (TB, 784) f32   one batch tile (ragged last tile may contain
    #                         out-of-range rows; they are never written back)
    # wt_ref: (784, 128) bf16 transposed, zero-padded weight (VMEM-resident)
    # b_ref : (1, 10)    f32  bias (VMEM-resident)
    # o_ref : (TB, 10)   f32
    x_bf = x_ref[...].astype(jnp.bfloat16)           # in-kernel cast (VPU slack)
    acc = jnp.dot(x_bf, wt_ref[...],
                  preferred_element_type=jnp.float32)  # MXU, f32 accumulate
    o_ref[...] = acc[:, :NUM_CLASSES] + b_ref[...]     # f32 bias add, 10-wide store


def prepare_params(weight, bias):
    """One-time param prep (hoisted out of the per-call forward).

    weight: (10, 784) PyTorch nn.Linear layout; bias: (10,).
    Returns (wt, b2d): (784, 128) bf16 zero-padded transposed weight and
    (1, 10) f32 bias.
    """
    wt = jnp.zeros((INPUT_SIZE, N_PAD), jnp.bfloat16)
    wt = wt.at[:, :NUM_CLASSES].set(weight.T.astype(jnp.bfloat16))
    b2d = bias.astype(jnp.float32).reshape(1, NUM_CLASSES)
    return wt, b2d


@functools.partial(jax.jit, static_argnames=("tb",))
def mnist_forward(xb, wt, b2d, *, tb=2048):
    """Forward pass of MnistModel.

    xb:  any shape with 784 trailing elements per sample (e.g. (B,1,28,28)), f32.
    wt:  (784, 128) bf16 from prepare_params.
    b2d: (1, 10) f32 from prepare_params.
    returns (B, 10) float32 logits.
    """
    x2d = xb.reshape(-1, INPUT_SIZE)
    B = x2d.shape[0]

    # --- static tile selection (trace time) ---
    tb = min(tb, _round_up(B, 8))            # never bigger than needed
    if B >= 512:
        # v7x megacore: ensure the "parallel" batch axis has >= 2 grid steps.
        tb = min(tb, max(256, _round_up(pl.cdiv(B, 2), 256)))
    tb = max(tb, 8)

    grid = (pl.cdiv(B, tb),)

    # Raise scoped VMEM to cover double-buffered tiles at the chosen tb
    # (v5e default 16 MiB is too small for tb >= 2048; v7x physical is 64 MiB
    #  so cap the request well below that).
    per_buf = (tb * INPUT_SIZE * 4          # x tile, f32
               + tb * N_PAD * 4             # out tile (lane-padded internally)
               + INPUT_SIZE * N_PAD * 2)    # resident weight
    vmem_limit = max(16 << 20, min(int(2.5 * per_buf) + (2 << 20), 48 << 20))

    cost = pl.CostEstimate(
        flops=2 * B * INPUT_SIZE * N_PAD,
        transcendentals=0,
        bytes_accessed=(B * INPUT_SIZE * 4        # x (f32, read once)
                        + INPUT_SIZE * N_PAD * 2  # weight (bf16)
                        + NUM_CLASSES * 4         # bias
                        + B * NUM_CLASSES * 4),   # output (f32, 10-wide)
    )

    out = pl.pallas_call(
        linear_kernel,
        out_shape=jax.ShapeDtypeStruct((B, NUM_CLASSES), jnp.float32),
        grid_spec=pltpu.PrefetchScalarGridSpec(
            num_scalar_prefetch=0,
            grid=grid,
            in_specs=[
                pl.BlockSpec((tb, INPUT_SIZE), lambda i: (i, 0)),      # x tile
                pl.BlockSpec((INPUT_SIZE, N_PAD), lambda i: (0, 0)),   # weight (resident)
                pl.BlockSpec((1, NUM_CLASSES), lambda i: (0, 0)),      # bias   (resident)
            ],
            out_specs=pl.BlockSpec((tb, NUM_CLASSES), lambda i: (i, 0)),
        ),
        compiler_params=pltpu.CompilerParams(
            dimension_semantics=("parallel",),     # megacore sharding on v7x
            vmem_limit_bytes=vmem_limit,
        ),
        cost_estimate=cost,
    )(x2d, wt, b2d)

    return out


def init_params(key):
    # Deterministic init mimicking nn.Linear's U(-1/sqrt(fan_in), 1/sqrt(fan_in)).
    kw, kb = jax.random.split(key)
    bound = 1.0 / (INPUT_SIZE ** 0.5)
    weight = jax.random.uniform(kw, (NUM_CLASSES, INPUT_SIZE),
                                minval=-bound, maxval=bound, dtype=jnp.float32)
    bias = jax.random.uniform(kb, (NUM_CLASSES,),
                              minval=-bound, maxval=bound, dtype=jnp.float32)
    return weight, bias


def _reference(xb, weight, bias):
    # Same-precision reference: bf16 operands, f32 accumulate, f32 bias add.
    x = xb.reshape(-1, INPUT_SIZE).astype(jnp.bfloat16)
    w = weight.T.astype(jnp.bfloat16)
    return jnp.dot(x, w, preferred_element_type=jnp.float32) + bias.astype(jnp.float32)


if __name__ == "__main__":
    key = jax.random.PRNGKey(0)
    k_x, k_p = jax.random.split(key)
    weight, bias = init_params(k_p)
    wt, b2d = prepare_params(weight, bias)   # hoisted, one-time prep

    # Small deterministic input, NCHW like the torch module.
    B = 8
    xb = jax.random.normal(k_x, (B, 1, 28, 28), dtype=jnp.float32)
    logits = mnist_forward(xb, wt, b2d)
    jax.block_until_ready(logits)
    assert logits.shape == (B, NUM_CLASSES)
    assert jnp.allclose(logits, _reference(xb, weight, bias), atol=2e-2, rtol=2e-2)

    # Exercise multi-tile grid with a ragged last block (B=300, tb=128 -> grid=3).
    B2 = 300
    xb2 = jax.random.normal(k_x, (B2, 1, 28, 28), dtype=jnp.float32)
    logits2 = mnist_forward(xb2, wt, b2d, tb=128)
    jax.block_until_ready(logits2)
    assert logits2.shape == (B2, NUM_CLASSES)
    assert jnp.allclose(logits2, _reference(xb2, weight, bias), atol=2e-2, rtol=2e-2)

    print("KERNEL_OK")
</pallas_src>

<mosaic_0001>
module attributes {stable_mosaic.version = 11 : i64} {
  func.func @linear_kernel(%arg0: i32, %arg1: memref<8x784xf32, #tpu.memory_space<vmem>>, %arg2: memref<784x128xbf16, #tpu.memory_space<vmem>>, %arg3: memref<1x10xf32, #tpu.memory_space<vmem>>, %arg4: memref<8x10xf32, #tpu.memory_space<vmem>>) attributes {dimension_semantics = [#tpu.dimension_semantics<parallel>], iteration_bounds = array<i64: 1>, scalar_prefetch = 0 : i64, scratch_operands = 0 : i64, tpu.core_type = #tpu.core_type<tc>, window_params = [{transform_indices = @transform_0, window_bounds = array<i64: 8, 784>}, {pipeline_mode = #tpu.pipeline_mode<synchronous>, transform_indices = @transform_1, window_bounds = array<i64: 784, 128>}, {pipeline_mode = #tpu.pipeline_mode<synchronous>, transform_indices = @transform_2, window_bounds = array<i64: 1, 10>}, {transform_indices = @transform_3, window_bounds = array<i64: 8, 10>}]} {
    %c0 = arith.constant 0 : index
    %c0_0 = arith.constant 0 : index
    %0 = vector.load %arg1[%c0, %c0_0] : memref<8x784xf32, #tpu.memory_space<vmem>>, vector<8x784xf32>
    %1 = arith.truncf %0 : vector<8x784xf32> to vector<8x784xbf16>
    %c0_1 = arith.constant 0 : index
    %c0_2 = arith.constant 0 : index
    %2 = vector.load %arg2[%c0_1, %c0_2] : memref<784x128xbf16, #tpu.memory_space<vmem>>, vector<784x128xbf16>
    %cst = arith.constant dense<0.000000e+00> : vector<8x128xf32>
    %3 = tpu.matmul %1, %2, %cst {dimension_numbers = #tpu.dot_dimension_numbers<[1], [0], [0], [1], [0, 0, 1, 1], [], []>} : vector<8x784xbf16>, vector<784x128xbf16>, vector<8x128xf32> -> vector<8x128xf32>
    %4 = vector.extract_strided_slice %3 {offsets = [0, 0], sizes = [8, 10], strides = [1, 1]} : vector<8x128xf32> to vector<8x10xf32>
    %c0_3 = arith.constant 0 : index
    %c0_4 = arith.constant 0 : index
    %5 = vector.load %arg3[%c0_3, %c0_4] : memref<1x10xf32, #tpu.memory_space<vmem>>, vector<1x10xf32>
    %6 = vector.broadcast %5 : vector<1x10xf32> to vector<8x10xf32>
    %7 = arith.addf %4, %6 : vector<8x10xf32>
    %c0_5 = arith.constant 0 : index
    %c0_6 = arith.constant 0 : index
    %8 = vector.load %arg4[%c0_5, %c0_6] : memref<8x10xf32, #tpu.memory_space<vmem>>, vector<8x10xf32>
    tpu.vector_store %arg4[%c0_5, %c0_6], %7 {strides = array<i32>} : memref<8x10xf32, #tpu.memory_space<vmem>>, vector<8x10xf32>,
    return
  }
  func.func @transform_0(%arg0: i32) -> (i32, i32) {
    %c0_i32 = arith.constant 0 : i32
    %c0_i32_0 = arith.constant 0 : i32
    return %arg0, %c0_i32 : i32, i32
  }
  func.func @transform_1(%arg0: i32) -> (i32, i32) {
    %c0_i32 = arith.constant 0 : i32
    %c0_i32_0 = arith.constant 0 : i32
    %c0_i32_1 = arith.constant 0 : i32
    return %c0_i32, %c0_i32_0 : i32, i32
  }
  func.func @transform_2(%arg0: i32) -> (i32, i32) {
    %c0_i32 = arith.constant 0 : i32
    %c0_i32_0 = arith.constant 0 : i32
    %c0_i32_1 = arith.constant 0 : i32
    return %c0_i32, %c0_i32_0 : i32, i32
  }
  func.func @transform_3(%arg0: i32) -> (i32, i32) {
    %c0_i32 = arith.constant 0 : i32
    %c0_i32_0 = arith.constant 0 : i32
    return %arg0, %c0_i32 : i32, i32
  }
}

</mosaic_0001>

<bundles_post_ra>
// kernel: mnist_forward.1
= control target key start
LH: loop header
LB: loop body
LE: loop exit
PB: predicated region body
PF: predicated region fallthrough
CT: control target
= control target key end

     0   :  { %v809_v41 = vmov 0.0   ;;  %vm810_vm0 = vmmov 0   ;;  %s1006_s0 = inlined_call_operand.vmem [shape: f32[8,784], index: 0, kind: input, shape index: {}]   ;;  %s1007_s1 = inlined_call_operand.vmem [shape: bf16[784,128], index: 1, kind: input, shape index: {}]   ;;  %s1008_s2 = inlined_call_operand.vmem [shape: f32[1,10], index: 2, kind: input, shape index: {}]   ;;  %s1009_s3 = inlined_call_operand.hbm [shape: f32[8,10], index: 3, kind: output, shape index: {}]  }
   0x1   :  { %v738_v0 = vld [vmem:[%s1007_s1 + $0x78] sm:$0xff]   ;;  %v742_v4 = vld [vmem:[%s1007_s1 + $0x70] sm:$0xff]   ;;  %v746_v8 = vld [vmem:[%s1007_s1 + $0x68] sm:$0xff]  }
   0x2   :  { %v739_v1 = vld [vmem:[%s1007_s1 + $0xf8] sm:$0xff]   ;;  %661 = vmatprep.subr.bf16.mxu0 %v738_v0  ;;  %v743_v5 = vld [vmem:[%s1007_s1 + $0xf0] sm:$0xff]   ;;  %v747_v9 = vld [vmem:[%s1007_s1 + $0xe8] sm:$0xff]  }
   0x3   :  { %v740_v2 = vld [vmem:[%s1007_s1 + $0x38] sm:$0xff]   ;;  %683 = vmatprep.subr.bf16.mxu1 %v739_v1  ;;  %v744_v6 = vld [vmem:[%s1007_s1 + $0x30] sm:$0xff]   ;;  %v748_v10 = vld [vmem:[%s1007_s1 + $0x28] sm:$0xff]  }
   0x4   :  { %v741_v3 = vld [vmem:[%s1007_s1 + $0xb8] sm:$0xff]   ;;  %662 = vmatpush3.bf16.msra.mxu0 %v740_v2  ;;  %v745_v7 = vld [vmem:[%s1007_s1 + $0xb0] sm:$0xff]   ;;  %v749_v11 = vld [vmem:[%s1007_s1 + $0xa8] sm:$0xff]  }
   0x5   :  { %684 = vmatpush3.bf16.msra.mxu1 %v741_v3  ;;  %663 = vmatprep.subr.bf16.mxu0 %v742_v4  ;;  %v750_v12 = vld [vmem:[%s1007_s1 + $0x60] sm:$0xff]   ;;  %v754_v16 = vld [vmem:[%s1007_s1 + $0x58] sm:$0xff]   ;;  %v758_v20 = vld [vmem:[%s1007_s1 + $0x50] sm:$0xff]  }
   0x6   :  { %685 = vmatprep.subr.bf16.mxu1 %v743_v5  ;;  %v751_v13 = vld [vmem:[%s1007_s1 + $0xe0] sm:$0xff]   ;;  %v755_v17 = vld [vmem:[%s1007_s1 + $0xd8] sm:$0xff]   ;;  %v759_v21 = vld [vmem:[%s1007_s1 + $0xd0] sm:$0xff]  }
   0x7   :  { %v752_v14 = vld [vmem:[%s1007_s1 + $0x20] sm:$0xff]   ;;  %v756_v18 = vld [vmem:[%s1007_s1 + $0x18] sm:$0xff]   ;;  %v760_v22 = vld [vmem:[%s1007_s1 + $0x10] sm:$0xff]  }
   0x8   :  { %664 = vmatpush3.bf16.msra.mxu0 %v744_v6  ;;  %v753_v15 = vld [vmem:[%s1007_s1 + $0xa0] sm:$0xff]   ;;  %v757_v19 = vld [vmem:[%s1007_s1 + $0x98] sm:$0xff]   ;;  %v761_v23 = vld [vmem:[%s1007_s1 + $0x90] sm:$0xff]  }
   0x9   :  { %686 = vmatpush3.bf16.msra.mxu1 %v745_v7  ;;  %665 = vmatprep.subr.bf16.mxu0 %v746_v8  ;;  %v762_v24 = vld [vmem:[%s1007_s1 + $0x48] sm:$0xff]   ;;  %v766_v28 = vld [vmem:[%s1007_s1 + $0x40] sm:$0xff]   ;;  %v19_v33 = vld [vmem:[%s1006_s0 + $0x18] sm:$0xff] }
   0xa   :  { %687 = vmatprep.subr.bf16.mxu1 %v747_v9  ;;  %v763_v25 = vld [vmem:[%s1007_s1 + $0xc8] sm:$0xff]   ;;  %v767_v29 = vld [vmem:[%s1007_s1 + $0xc0] sm:$0xff]   ;;  %v26_v36 = vpack.c.bf16 %v19_v33, %v19_v33  ;;  %v18_v38 = vld [vmem:[%s1006_s0 + $0x10] sm:$0xff] }
   0xb   :  { %v764_v26 = vld [vmem:[%s1007_s1 + $0x8] sm:$0xff]   ;;  %v768_v30 = vld [vmem:[%s1007_s1] sm:$0xff]   ;;  %v25_v39 = vpack.c.bf16 %v18_v38, %v18_v38  ;;  %v770_v40 = vld [vmem:[%s1007_s1 + $0x178] sm:$0xff]  }
   0xc   :  { %666 = vmatpush3.bf16.msra.mxu0 %v748_v10  ;;  %v765_v27 = vld [vmem:[%s1007_s1 + $0x88] sm:$0xff]   ;;  %v769_v31 = vld [vmem:[%s1007_s1 + $0x80] sm:$0xff]   ;;  %498 = vmatprep.mubr.bf16.mxu1 %v26_v36  ;;  %v771_v42 = vld [vmem:[%s1007_s1 + $0x138] sm:$0xff]  }
   0xd   :  { %688 = vmatpush3.bf16.msra.mxu1 %v749_v11  ;;  %667 = vmatprep.subr.bf16.mxu0 %v750_v12  ;;  %v17_v32 = vld [vmem:[%s1006_s0 + $0x8] sm:$0xff]  ;;  %v16_v34 = vld [vmem:[%s1006_s0] sm:$0xff]  ;;  %v772_v43 = vld [vmem:[%s1007_s1 + $0x170] sm:$0xff]  }
   0xe   :  { %689 = vmatprep.subr.bf16.mxu1 %v751_v13  ;;  %v24_v35 = vpack.c.bf16 %v17_v32, %v17_v32  ;;  %v23_v37 = vpack.c.bf16 %v16_v34, %v16_v34  ;;  %v773_v44 = vld [vmem:[%s1007_s1 + $0x130] sm:$0xff]   ;;  %v774_v45 = vld [vmem:[%s1007_s1 + $0x168] sm:$0xff]   ;;  %v776_v47 = vld [vmem:[%s1007_s1 + $0x160] sm:$0xff]  }
   0xf   :  { %v775_v46 = vld [vmem:[%s1007_s1 + $0x128] sm:$0xff]   ;;  %v777_v48 = vld [vmem:[%s1007_s1 + $0x120] sm:$0xff]   ;;  %v778_v49 = vld [vmem:[%s1007_s1 + $0x158] sm:$0xff]  }
  0x10   :  { %668 = vmatpush3.bf16.msra.mxu0 %v752_v14  ;;  %458 = vmatprep.mubr.bf16.mxu0 %v24_v35  ;;  %v779_v50 = vld [vmem:[%s1007_s1 + $0x118] sm:$0xff]   ;;  %v786_v51 = vld [vmem:[%s1007_s1 + $0x180] sm:$0xff]   ;;  %v21_v52 = vld [vmem:[%s1006_s0 + $0x28] sm:$0xff] }
  0x11   :  { %690 = vmatpush3.bf16.msra.mxu1 %v753_v15  ;;  %669 = vmatprep.subr.bf16.mxu0 %v754_v16  ;;  %v780_v53 = vld [vmem:[%s1007_s1 + $0x150] sm:$0xff]   ;;  %v28_v54 = vpack.c.bf16 %v21_v52, %v21_v52 }
  0x12   :  { %691 = vmatprep.subr.bf16.mxu1 %v755_v17  ;;  %v22_v55 = vld [vmem:[%s1006_s0 + $0x30] sm:$0xff] }
  0x14   :  { %670 = vmatpush3.bf16.msra.mxu0 %v756_v18 }
  0x15   :  { %692 = vmatpush3.bf16.msra.mxu1 %v757_v19  ;;  %671 = vmatprep.subr.bf16.mxu0 %v758_v20 }
  0x16   :  { %693 = vmatprep.subr.bf16.mxu1 %v759_v21 }
  0x18   :  { %672 = vmatpush3.bf16.msra.mxu0 %v760_v22 }
  0x19   :  { %694 = vmatpush3.bf16.msra.mxu1 %v761_v23  ;;  %673 = vmatprep.subr.bf16.mxu0 %v762_v24 }
  0x1a   :  { %695 = vmatprep.subr.bf16.mxu1 %v763_v25 }
  0x1c   :  { %674 = vmatpush3.bf16.msra.mxu0 %v764_v26 }
  0x1d   :  { %696 = vmatpush3.bf16.msra.mxu1 %v765_v27  ;;  %675 = vmatprep.subr.bf16.mxu0 %v766_v28 }
  0x1e   :  { %697 = vmatprep.subr.bf16.mxu1 %v767_v29 }
  0x20   :  { %676 = vmatpush3.bf16.msra.mxu0 %v768_v30 }
  0x21   :  { %698 = vmatpush3.bf16.msra.mxu1 %v769_v31  ;;  %705 = vmatprep.subr.bf16.mxu0 %v770_v40 }
  0x22   :  { %729 = vmatprep.subr.bf16.mxu1 %v809_v41 }
  0x23   :  { %459 = vmatmul.mubr.bf16.vlgmr.msra.gmra.mxu0 %v23_v37 }
  0x24   :  { %499 = vmatmul.mubr.bf16.vlgmr.msra.gmra.mxu1 %v25_v39  ;;  %706 = vmatpush3.bf16.msra.mxu0 %v771_v42 }
  0x25   :  { %731 = vmatprep.mubr.msk.bf16.mxu1 %vm810_vm0, %v809_v41  ;;  %707 = vmatprep.subr.bf16.mxu0 %v772_v43 }
  0x28   :  { %708 = vmatpush3.bf16.msra.mxu0 %v773_v44 }
  0x29   :  { %709 = vmatprep.subr.bf16.mxu0 %v774_v45 }
  0x2c   :  { %710 = vmatpush3.bf16.msra.mxu0 %v775_v46 }
  0x2d   :  { %711 = vmatprep.subr.bf16.mxu0 %v776_v47 }
  0x30   :  { %712 = vmatpush3.bf16.msra.mxu0 %v777_v48 }
  0x31   :  { %713 = vmatprep.subr.bf16.mxu0 %v778_v49 }
  0x32   :  { %8 = vsyncpa [#allocation3], 0  ;;  %730 = vmatpush3.bf16.msra.mxu1 %v786_v51  ;;  %v29_v56 = vpack.c.bf16 %v22_v55, %v22_v55  ;;  %vm422_vm1 = vcmask 130048   ;;  %538 = vmatprep.mubr.bf16.mxu0 %v28_v54  ;;  %v781_v57 = vld [vmem:[%s1007_s1 + $0x110] sm:$0xff]   ;;  %v782_v58 = vld [vmem:[%s1007_s1 + $0x148] sm:$0xff]   ;;  %s811_s16 = smov [#allocation2]  }
  0x33   :  { %v783_v59 = vld [vmem:[%s1007_s1 + $0x108] sm:$0xff]   ;;  %v784_v60 = vld [vmem:[%s1007_s1 + $0x140] sm:$0xff]   ;;  %s602_s17 = sshll.u32 %s811_s16, 4  ;;  %vm594_vm2 = vcmask 80896   ;;  %s603_s17 = int_to_ptr.vmem [resolvable:$true] %s602_s17 }
  0x34   :  { %714 = vmatpush3.bf16.msra.mxu0 %v779_v50  ;;  %v785_v61 = vld [vmem:[%s1007_s1 + $0x100] sm:$0xff]   ;;  %s787_s18 = scalar_lea.vmem %s603_s17, 128  ;;  %p792_p1 = scmp.lt.s32.totalorder %s603_s17, %s603_s17 }
  0x35   :  { %715 = vmatprep.subr.bf16.mxu0 %v780_v53  ;;  %732 = vmatmul.mubr.msk.bf16.vlgmr.msra.gmra.mxu1 %vm422_vm1, %v29_v56  ;;  %v20_v62 = vld [vmem:[%s1006_s0 + $0x20] sm:$0xff]  ;;  %p788_p0 = scmp.ne.s32.totalorder %s603_s17, %s787_s18  ;;  %p793_p2 = scmp.lt.s32.totalorder %s787_s18, %s787_s18 }
  0x36   :  { %v27_v63 = vpack.c.bf16 %v20_v62, %v20_v62  ;;  %v660_v21 = vld [vmem:[%s1008_s2] ss:$0 sm:$0xff] }
  0x37   :  { %p794_p3 = por %p793_p2, %p792_p1 }
  0x38   :  { %716 = vmatpush3.bf16.msra.mxu0 %v781_v57 }
  0x39   :  { %717 = vmatprep.subr.bf16.mxu0 %v782_v58  ;;  %p795_p4 = pnand %p794_p3, %p788_p0 }
  0x3c   :  { %718 = vmatpush3.bf16.msra.mxu0 %v783_v59 }
  0x3d   :  { %719 = vmatprep.subr.bf16.mxu0 %v784_v60 }
  0x40   :  { %720 = vmatpush3.bf16.msra.mxu0 %v785_v61 }
  0x43   :  { %539 = vmatmul.mubr.bf16.vlgmr.msra.gmra.mxu0 %v27_v63 }
  0xe3   :  { %v677_v0 = vpop.f32.mrf.mxu0 }
  0xe4   :  { %v699_v1 = vpop.f32.mrf.mxu1 }
  0xe5   :  { %v678_v2 = vpop.f32.mrf.mxu0 }
  0xe6   :  { %v700_v3 = vpop.f32.mrf.mxu1  ;;  %v679_v12 = vadd.f32 %v678_v2, %v677_v0 }
  0xe7   :  { %v680_v4 = vpop.f32.mrf.mxu0  ;;  %v701_v13 = vadd.f32 %v700_v3, %v699_v1 }
  0xe8   :  { %v702_v5 = vpop.f32.mrf.mxu1 }
  0xe9   :  { %v681_v6 = vpop.f32.mrf.mxu0  ;;  %v501_v16 = vadd.f32 %v701_v13, %v679_v12 }
  0xea   :  { %v703_v7 = vpop.f32.mrf.mxu1 }
  0xf5   :  { %v580_v8 = vpop.f32.mrf.mxu1 }
  0xf7   :  { %v733_v9 = vpop.f32.mrf.mxu1 }
  0xf9   :  { %v583_v10 = vpop.f32.mrf.mxu1 }
  0xfb   :  { %v734_v11 = vpop.f32.mrf.mxu1 }
 0x103   :  { %v721_v14 = vpop.f32.mrf.mxu0 }
 0x105   :  { %v722_v15 = vpop.f32.mrf.mxu0 }
 0x106   :  { %v723_v17 = vadd.f32 %v722_v15, %v721_v14 }
 0x107   :  { %v724_v18 = vpop.f32.mrf.mxu0 }
 0x108   :  { %v541_v19 = vadd.f32 %v723_v17, %v501_v16 }
 0x109   :  { %v725_v20 = vpop.f32.mrf.mxu0 }
 0x10a   :  { %v581_v22 = vadd.f32 %v580_v8, %v541_v19 }
 0x10c   :  { %v593_v23 = vadd.f32 %v660_v21, %v581_v22 }
 0x10e   :  { %595 = vst.msk [vmem:[#allocation2] sm:$0xff] %vm594_vm2, %v593_v23 }
 0x10f   :  { %798 = shalt.err (!%p795_p4)
}
 0x110   :  { %605 = dma.vmem_to_hbm [thread:$0]  %s603_s17, 128, %s1009_s3, [#allocation3]  }
 0x111   :  { %807 = dma.done.wait [#allocation3], 128  }
 0x112   :  { %808 = vsyncadd [#allocation3], 4294967168 }
 0x113   :  { %609 = vsyncpa [#allocation3], 1 }

</bundles_post_ra>
